<compile_context>
chip_gen: v7x
topology: tpu7x:2x2x1
jax: 0.10.0
libtpu: 0.0.40
codegen_flags: <defaults>
</compile_context>

<pallas_src>
import jax
import jax.numpy as jnp
from jax.experimental import pallas as pl
from jax.experimental.pallas import tpu as pltpu

LATENT_DIM = 10
H1 = 512
H2 = 256
OUT = 1

TB_MAX = 1024  # batch-tile cap: ~3.5 MiB live set, safe on v7x's 64 MiB VMEM


def _round_up(x, m):
    return ((x + m - 1) // m) * m


def _discriminator_kernel(z_ref, w1_ref, b1_ref, w2_ref, b2_ref,
                          w3_ref, b3_ref, out_ref):
    # z tile [TB, 10]; cast to bf16 for the MXU, accumulate in f32.
    z = z_ref[...].astype(jnp.bfloat16)

    # Layer 1: Linear(10 -> 512) + LeakyReLU(0.2)   (MXU, bf16 in / f32 acc)
    h1 = jnp.dot(z, w1_ref[...], preferred_element_type=jnp.float32) + b1_ref[...]
    h1 = jnp.maximum(h1, 0.2 * h1)

    # Layer 2: Linear(512 -> 256) + LeakyReLU(0.2)  (dominant matmul)
    h2 = jnp.dot(h1.astype(jnp.bfloat16), w2_ref[...],
                 preferred_element_type=jnp.float32) + b2_ref[...]
    h2 = jnp.maximum(h2, 0.2 * h2)

    # Layer 3: Linear(256 -> 1) as VPU multiply + cross-lane reduce (XLU),
    # instead of a lane-width-1 MXU matmul.  w3_ref is a [1, 256] f32 row.
    h3 = jnp.sum(h2 * w3_ref[...], axis=-1, keepdims=True) + b3_ref[...]

    # Sigmoid: exp on EUP, approximate reciprocal on EUP (free slots).
    out_ref[...] = pl.reciprocal(1.0 + jnp.exp(-h3), approx=True)


def discriminator_forward(z, params, tb_max=TB_MAX):
    """z: [B, LATENT_DIM] float32 -> validity: [B, 1] float32."""
    w1, b1, w2, b2, w3, b3 = params
    B = z.shape[0]

    # Pick the batch tile: small batches -> one (8-aligned) tile, large
    # batches -> tb_max-row tiles; pad B up to a multiple of TB.
    TB = min(tb_max, _round_up(B, 8))
    Bp = _round_up(B, TB)
    if Bp != B:
        z = jnp.pad(z, ((0, Bp - B), (0, 0)))

    # bf16 weights for the MXU (halves weight DMA bytes); biases stay f32.
    w1_bf = w1.astype(jnp.bfloat16)
    w2_bf = w2.astype(jnp.bfloat16)
    # Layer-3 weight as a [1, 256] f32 row for the VPU reduction.
    w3_row = jnp.transpose(w3).astype(jnp.float32)

    grid = (pl.cdiv(Bp, TB),)

    out = pl.pallas_call(
        _discriminator_kernel,
        out_shape=jax.ShapeDtypeStruct((Bp, OUT), jnp.float32),
        grid=grid,
        in_specs=[
            pl.BlockSpec((TB, LATENT_DIM), lambda i: (i, 0)),   # z tile
            pl.BlockSpec((LATENT_DIM, H1), lambda i: (0, 0)),   # w1 (resident)
            pl.BlockSpec((1, H1),          lambda i: (0, 0)),   # b1
            pl.BlockSpec((H1, H2),         lambda i: (0, 0)),   # w2 (resident)
            pl.BlockSpec((1, H2),          lambda i: (0, 0)),   # b2
            pl.BlockSpec((1, H2),          lambda i: (0, 0)),   # w3 row
            pl.BlockSpec((1, OUT),         lambda i: (0, 0)),   # b3
        ],
        out_specs=pl.BlockSpec((TB, OUT), lambda i: (i, 0)),
        compiler_params=pltpu.CompilerParams(
            dimension_semantics=("parallel",)),
    )(z, w1_bf, b1, w2_bf, b2, w3_row, b3)

    return out[:B]


def init_params(key):
    """Deterministic init mimicking PyTorch's default Linear init
    (uniform in +/- 1/sqrt(fan_in)). Weights stored as [in, out]."""
    def linear_init(k, fan_in, fan_out):
        kw, kb = jax.random.split(k)
        bound = 1.0 / jnp.sqrt(fan_in)
        w = jax.random.uniform(kw, (fan_in, fan_out), jnp.float32, -bound, bound)
        b = jax.random.uniform(kb, (1, fan_out), jnp.float32, -bound, bound)
        return w, b

    k1, k2, k3 = jax.random.split(key, 3)
    w1, b1 = linear_init(k1, LATENT_DIM, H1)
    w2, b2 = linear_init(k2, H1, H2)
    w3, b3 = linear_init(k3, H2, OUT)
    return (w1, b1, w2, b2, w3, b3)


def reference_forward(z, params):
    """Pure-JAX f32 reference for correctness checking."""
    w1, b1, w2, b2, w3, b3 = params
    h1 = z @ w1 + b1
    h1 = jnp.where(h1 > 0, h1, 0.2 * h1)
    h2 = h1 @ w2 + b2
    h2 = jnp.where(h2 > 0, h2, 0.2 * h2)
    h3 = h2 @ w3 + b3
    return jax.nn.sigmoid(h3)


if __name__ == "__main__":
    key = jax.random.PRNGKey(0)
    k_params, k_z1, k_z2 = jax.random.split(key, 3)

    params = init_params(k_params)

    # Small batch: single tile, grid = (1,).
    B = 8
    z = jax.random.normal(k_z1, (B, LATENT_DIM), dtype=jnp.float32)
    out = jax.block_until_ready(discriminator_forward(z, params))
    ref = reference_forward(z, params)
    assert out.shape == (B, OUT), out.shape
    # bf16 matmul operands (f32 accumulation) -> loosened tolerance vs f32 ref.
    assert jnp.allclose(out, ref, atol=3e-2, rtol=3e-2), (
        f"max abs err = {jnp.max(jnp.abs(out - ref))}")

    # Larger batch with a small tile cap: exercises multi-step grid + padding.
    B2 = 200
    z2 = jax.random.normal(k_z2, (B2, LATENT_DIM), dtype=jnp.float32)
    out2 = jax.block_until_ready(discriminator_forward(z2, params, tb_max=64))
    ref2 = reference_forward(z2, params)
    assert out2.shape == (B2, OUT), out2.shape
    assert jnp.allclose(out2, ref2, atol=3e-2, rtol=3e-2), (
        f"max abs err = {jnp.max(jnp.abs(out2 - ref2))}")

    print("KERNEL_OK")
</pallas_src>

<mosaic_0001>
module attributes {stable_mosaic.version = 11 : i64} {
  func.func @_discriminator_kernel(%arg0: i32, %arg1: memref<8x10xf32, #tpu.memory_space<vmem>>, %arg2: memref<10x512xbf16, #tpu.memory_space<vmem>>, %arg3: memref<1x512xf32, #tpu.memory_space<vmem>>, %arg4: memref<512x256xbf16, #tpu.memory_space<vmem>>, %arg5: memref<1x256xf32, #tpu.memory_space<vmem>>, %arg6: memref<1x256xf32, #tpu.memory_space<vmem>>, %arg7: memref<1x1xf32, #tpu.memory_space<vmem>>, %arg8: memref<8x1xf32, #tpu.memory_space<vmem>>) attributes {dimension_semantics = [#tpu.dimension_semantics<parallel>], iteration_bounds = array<i64: 1>, scalar_prefetch = 0 : i64, scratch_operands = 0 : i64, tpu.core_type = #tpu.core_type<tc>, window_params = [{transform_indices = @transform_0, window_bounds = array<i64: 8, 10>}, {pipeline_mode = #tpu.pipeline_mode<synchronous>, transform_indices = @transform_1, window_bounds = array<i64: 10, 512>}, {pipeline_mode = #tpu.pipeline_mode<synchronous>, transform_indices = @transform_2, window_bounds = array<i64: 1, 512>}, {pipeline_mode = #tpu.pipeline_mode<synchronous>, transform_indices = @transform_3, window_bounds = array<i64: 512, 256>}, {pipeline_mode = #tpu.pipeline_mode<synchronous>, transform_indices = @transform_4, window_bounds = array<i64: 1, 256>}, {pipeline_mode = #tpu.pipeline_mode<synchronous>, transform_indices = @transform_5, window_bounds = array<i64: 1, 256>}, {pipeline_mode = #tpu.pipeline_mode<synchronous>, transform_indices = @transform_6, window_bounds = array<i64: 1, 1>}, {transform_indices = @transform_7, window_bounds = array<i64: 8, 1>}]} {
    %c0 = arith.constant 0 : index
    %c0_0 = arith.constant 0 : index
    %0 = vector.load %arg1[%c0, %c0_0] : memref<8x10xf32, #tpu.memory_space<vmem>>, vector<8x10xf32>
    %1 = arith.truncf %0 : vector<8x10xf32> to vector<8x10xbf16>
    %c0_1 = arith.constant 0 : index
    %c0_2 = arith.constant 0 : index
    %2 = vector.load %arg2[%c0_1, %c0_2] : memref<10x512xbf16, #tpu.memory_space<vmem>>, vector<10x512xbf16>
    %cst = arith.constant dense<0.000000e+00> : vector<8x512xf32>
    %3 = tpu.matmul %1, %2, %cst {dimension_numbers = #tpu.dot_dimension_numbers<[1], [0], [0], [1], [0, 0, 1, 1], [], []>} : vector<8x10xbf16>, vector<10x512xbf16>, vector<8x512xf32> -> vector<8x512xf32>
    %c0_3 = arith.constant 0 : index
    %c0_4 = arith.constant 0 : index
    %4 = vector.load %arg3[%c0_3, %c0_4] : memref<1x512xf32, #tpu.memory_space<vmem>>, vector<1x512xf32>
    %5 = vector.broadcast %4 : vector<1x512xf32> to vector<8x512xf32>
    %6 = arith.addf %3, %5 : vector<8x512xf32>
    %cst_5 = arith.constant 2.000000e-01 : f32
    %7 = vector.broadcast %cst_5 : f32 to vector<8x512xf32>
    %8 = arith.mulf %7, %6 : vector<8x512xf32>
    %9 = arith.maximumf %6, %8 : vector<8x512xf32>
    %10 = arith.truncf %9 : vector<8x512xf32> to vector<8x512xbf16>
    %c0_6 = arith.constant 0 : index
    %c0_7 = arith.constant 0 : index
    %11 = vector.load %arg4[%c0_6, %c0_7] : memref<512x256xbf16, #tpu.memory_space<vmem>>, vector<512x256xbf16>
    %cst_8 = arith.constant dense<0.000000e+00> : vector<8x256xf32>
    %12 = tpu.matmul %10, %11, %cst_8 {dimension_numbers = #tpu.dot_dimension_numbers<[1], [0], [0], [1], [0, 0, 1, 1], [], []>} : vector<8x512xbf16>, vector<512x256xbf16>, vector<8x256xf32> -> vector<8x256xf32>
    %c0_9 = arith.constant 0 : index
    %c0_10 = arith.constant 0 : index
    %13 = vector.load %arg5[%c0_9, %c0_10] : memref<1x256xf32, #tpu.memory_space<vmem>>, vector<1x256xf32>
    %14 = vector.broadcast %13 : vector<1x256xf32> to vector<8x256xf32>
    %15 = arith.addf %12, %14 : vector<8x256xf32>
    %cst_11 = arith.constant 2.000000e-01 : f32
    %16 = vector.broadcast %cst_11 : f32 to vector<8x256xf32>
    %17 = arith.mulf %16, %15 : vector<8x256xf32>
    %18 = arith.maximumf %15, %17 : vector<8x256xf32>
    %c0_12 = arith.constant 0 : index
    %c0_13 = arith.constant 0 : index
    %19 = vector.load %arg6[%c0_12, %c0_13] : memref<1x256xf32, #tpu.memory_space<vmem>>, vector<1x256xf32>
    %20 = vector.broadcast %19 : vector<1x256xf32> to vector<8x256xf32>
    %21 = arith.mulf %18, %20 : vector<8x256xf32>
    %cst_14 = arith.constant dense<0.000000e+00> : vector<8xf32>
    %22 = vector.multi_reduction <add>, %21, %cst_14 [1] : vector<8x256xf32> to vector<8xf32>
    %23 = vector.shape_cast %22 : vector<8xf32> to vector<8x1xf32>
    %c0_15 = arith.constant 0 : index
    %c0_16 = arith.constant 0 : index
    %24 = vector.load %arg7[%c0_15, %c0_16] : memref<1x1xf32, #tpu.memory_space<vmem>>, vector<1x1xf32>
    %25 = vector.broadcast %24 : vector<1x1xf32> to vector<8x1xf32>
    %26 = arith.addf %23, %25 : vector<8x1xf32>
    %cst_17 = arith.constant 0.000000e+00 : f32
    %27 = vector.broadcast %cst_17 : f32 to vector<8x1xf32>
    %28 = arith.subf %27, %26 : vector<8x1xf32>
    %29 = math.exp %28 : vector<8x1xf32>
    %cst_18 = arith.constant 1.000000e+00 : f32
    %30 = vector.broadcast %cst_18 : f32 to vector<8x1xf32>
    %31 = arith.addf %30, %29 : vector<8x1xf32>
    %32 = tpu.reciprocal %31 {approx = true} : vector<8x1xf32> -> vector<8x1xf32>
    %c0_19 = arith.constant 0 : index
    %c0_20 = arith.constant 0 : index
    %33 = vector.load %arg8[%c0_19, %c0_20] : memref<8x1xf32, #tpu.memory_space<vmem>>, vector<8x1xf32>
    tpu.vector_store %arg8[%c0_19, %c0_20], %32 {strides = array<i32>} : memref<8x1xf32, #tpu.memory_space<vmem>>, vector<8x1xf32>,
    return
  }
  func.func @transform_0(%arg0: i32) -> (i32, i32) {
    %c0_i32 = arith.constant 0 : i32
    %c0_i32_0 = arith.constant 0 : i32
    return %arg0, %c0_i32 : i32, i32
  }
  func.func @transform_1(%arg0: i32) -> (i32, i32) {
    %c0_i32 = arith.constant 0 : i32
    %c0_i32_0 = arith.constant 0 : i32
    %c0_i32_1 = arith.constant 0 : i32
    return %c0_i32, %c0_i32_0 : i32, i32
  }
  func.func @transform_2(%arg0: i32) -> (i32, i32) {
    %c0_i32 = arith.constant 0 : i32
    %c0_i32_0 = arith.constant 0 : i32
    %c0_i32_1 = arith.constant 0 : i32
    return %c0_i32, %c0_i32_0 : i32, i32
  }
  func.func @transform_3(%arg0: i32) -> (i32, i32) {
    %c0_i32 = arith.constant 0 : i32
    %c0_i32_0 = arith.constant 0 : i32
    %c0_i32_1 = arith.constant 0 : i32
    return %c0_i32, %c0_i32_0 : i32, i32
  }
  func.func @transform_4(%arg0: i32) -> (i32, i32) {
    %c0_i32 = arith.constant 0 : i32
    %c0_i32_0 = arith.constant 0 : i32
    %c0_i32_1 = arith.constant 0 : i32
    return %c0_i32, %c0_i32_0 : i32, i32
  }
  func.func @transform_5(%arg0: i32) -> (i32, i32) {
    %c0_i32 = arith.constant 0 : i32
    %c0_i32_0 = arith.constant 0 : i32
    %c0_i32_1 = arith.constant 0 : i32
    return %c0_i32, %c0_i32_0 : i32, i32
  }
  func.func @transform_6(%arg0: i32) -> (i32, i32) {
    %c0_i32 = arith.constant 0 : i32
    %c0_i32_0 = arith.constant 0 : i32
    %c0_i32_1 = arith.constant 0 : i32
    return %c0_i32, %c0_i32_0 : i32, i32
  }
  func.func @transform_7(%arg0: i32) -> (i32, i32) {
    %c0_i32 = arith.constant 0 : i32
    %c0_i32_0 = arith.constant 0 : i32
    return %arg0, %c0_i32 : i32, i32
  }
}

</mosaic_0001>

<bundles_post_ra>
// kernel: tpu_custom_call.1
= control target key start
LH: loop header
LB: loop body
LE: loop exit
PB: predicated region body
PF: predicated region fallthrough
CT: control target
= control target key end

     0   :  { %s1103_s0 = inlined_call_operand.hbm [shape: f32[8,10], index: 0, kind: input, shape index: {}]   ;;  %s1104_s1 = inlined_call_operand.hbm [shape: bf16[10,512], index: 1, kind: input, shape index: {}]   ;;  %s1105_s2 = inlined_call_operand.vmem [shape: f32[1,512], index: 2, kind: input, shape index: {}]   ;;  %s1106_s3 = inlined_call_operand.hbm [shape: bf16[512,256], index: 3, kind: input, shape index: {}]   ;;  %s1107_s4 = inlined_call_operand.vmem [shape: f32[1,256], index: 4, kind: input, shape index: {}]   ;;  %s1108_s5 = inlined_call_operand.vmem [shape: f32[1,256], index: 5, kind: input, shape index: {}]   ;;  %s1109_s6 = inlined_call_operand.<no memory space> [shape: f32[1,1], index: 6, kind: input, shape index: {}]   ;;  %s1110_s7 = inlined_call_operand.vmem [shape: f32[8,1], index: 7, kind: output, shape index: {}]  }
   0x1   :  { %v12_v0 = vstv %s1109_s6 }
   0x2   :  { %13 = vst [vmem:[#allocation2] sm:$0x1] %v12_v0 }
   0x3   :  { %14 = vsyncpa [#allocation4], 0 }
   0x4   :  { %15 = vsyncpa [#allocation6], 0  ;;  %s1004_s26 = smov [#allocation5]   ;;  %s934_s30 = scalar_lea.hbm %s1104_s1, 512 }
   0x5   :  { %s31_s27 = sshll.u32 %s1004_s26, 4  ;;  %p935_p0 = scmp.ne.s32.totalorder %s1104_s1, %s934_s30  ;;  %s32_s27 = int_to_ptr.vmem [resolvable:$true] %s31_s27 }
   0x6   :  { %p938_p1 = scmp.lt.u32.totalorder %s934_s30, %s1104_s1 }
   0x8   :  { %p940_p2 = pnand %p938_p1, %p935_p0 }
   0xa   :  { %943 = shalt.err (!%p940_p2)
}
   0xb   :  { %s944_s6 = scalar_lea.vmem %s32_s27, 512  ;;  %p949_p4 = scmp.lt.s32.totalorder %s32_s27, %s32_s27 }
   0xc   :  { %p945_p3 = scmp.ne.s32.totalorder %s32_s27, %s944_s6  ;;  %p950_p5 = scmp.lt.s32.totalorder %s944_s6, %s944_s6 }
   0xe   :  { %p951_p6 = por %p950_p5, %p949_p4 }
  0x10   :  { %p952_p7 = pnand %p951_p6, %p945_p3 }
  0x12   :  { %955 = shalt.err (!%p952_p7)
}
  0x13   :  { %s1005_s12 = smov 256   ;;  %s1006_s13 = smov 16  }
  0x14   :  { %37 = dma.hbm_to_vmem [thread:$0]  %s1104_s1, 512, %s32_s27, [#allocation6], %s1005_s12, %s1005_s12, %s1006_s13  }
  0x15   :  { %s1007_s16 = smov [#allocation3]   ;;  %s1008_s18 = smov [#allocation7]  }
  0x16   :  { %s22_s17 = sshll.u32 %s1007_s16, 4  ;;  %s45_s19 = sshll.u32 %s1008_s18, 4  ;;  %s23_s17 = int_to_ptr.vmem [resolvable:$true] %s22_s17  ;;  %s46_s19 = int_to_ptr.vmem [resolvable:$true] %s45_s19 }
  0x17   :  { %s956_s22 = scalar_lea.hbm %s1103_s0, 128 }
  0x18   :  { %p957_p8 = scmp.ne.s32.totalorder %s1103_s0, %s956_s22  ;;  %p960_p9 = scmp.lt.u32.totalorder %s956_s22, %s1103_s0 }
  0x1a   :  { %p962_p10 = pnand %p960_p9, %p957_p8 }
  0x1c   :  { %965 = shalt.err (!%p962_p10)
}
  0x1d   :  { %s966_s1 = scalar_lea.vmem %s23_s17, 128  ;;  %p971_p12 = scmp.lt.s32.totalorder %s23_s17, %s23_s17 }
  0x1e   :  { %p967_p11 = scmp.ne.s32.totalorder %s23_s17, %s966_s1  ;;  %p972_p13 = scmp.lt.s32.totalorder %s966_s1, %s966_s1 }
  0x20   :  { %p973_p0 = por %p972_p13, %p971_p12 }
  0x22   :  { %p974_p1 = pnand %p973_p0, %p967_p11 }
  0x24   :  { %977 = shalt.err (!%p974_p1)
}
  0x25   :  { %25 = dma.hbm_to_vmem [thread:$0]  %s1103_s0, 128, %s23_s17, [#allocation4]  }
  0x26   :  { %s978_s8 = scalar_lea.hbm %s1106_s3, 8192 }
  0x27   :  { %p979_p2 = scmp.ne.s32.totalorder %s1106_s3, %s978_s8  ;;  %p982_p3 = scmp.lt.u32.totalorder %s978_s8, %s1106_s3 }
  0x29   :  { %p984_p4 = pnand %p982_p3, %p979_p2 }
  0x2b   :  { %987 = shalt.err (!%p984_p4)
}
  0x2c   :  { %s988_s12 = scalar_lea.vmem %s46_s19, 8192  ;;  %p993_p6 = scmp.lt.s32.totalorder %s46_s19, %s46_s19 }
  0x2d   :  { %p989_p5 = scmp.ne.s32.totalorder %s46_s19, %s988_s12  ;;  %p994_p7 = scmp.lt.s32.totalorder %s988_s12, %s988_s12 }
  0x2f   :  { %p995_p8 = por %p994_p7, %p993_p6 }
  0x31   :  { %p996_p9 = pnand %p995_p8, %p989_p5 }
  0x33   :  { %999 = shalt.err (!%p996_p9)
}
  0x34   :  { %s1009_s0 = smov 128   ;;  %s1010_s13 = smov 8  }
  0x35   :  { %51 = dma.hbm_to_vmem [thread:$0]  %s1106_s3, 8192, %s46_s19, [#allocation6], %s1009_s0, %s1009_s0, %s1010_s13  }
  0x36   :  { %1000 = dma.done.wait [#allocation4], 128  }
  0x37   :  { %1001 = vsyncadd [#allocation4], 4294967168 }
  0x38   :  { %1002 = dma.done.wait [#allocation6], 8704  }
  0x39   :  { %1003 = vsyncadd [#allocation6], 4294958592  ;;  %v1011_v1 = vmov 0   ;;  %vm116_vm0 = vcmask 1044480   ;;  %v68_v6 = vld [vmem:[#allocation3] sm:$0xff]  ;;  %vm112_vm1 = vcmask 80896  }
  0x3a   :  { %161 = vmatprep.mubr.bf16.mxu0 %v1011_v1  ;;  %202 = vmatprep.mubr.bf16.mxu1 %v1011_v1  ;;  %v828_v2 = vld [vmem:[#allocation5 + $0x4] ss:$16 sps:$4 sm:$0x1f]   ;;  %v830_v3 = vld [vmem:[#allocation5 + $0xc] ss:$16 sps:$4 sm:$0x1f]   ;;  %v69_v9 = vpack.c.bf16 %v68_v6, %v68_v6 }
  0x3b   :  { %747 = vmatprep.subr.msk.bf16.mxu0 %vm116_vm0, %v828_v2  ;;  %v832_v4 = vld [vmem:[#allocation5] ss:$16 sps:$4 sm:$0x1f]   ;;  %v833_v5 = vld [vmem:[#allocation5 + $0x8] ss:$16 sps:$4 sm:$0x1f]   ;;  %749 = vmatprep.subr.msk.bf16.mxu1 %vm116_vm0, %v830_v3 }
  0x3c   :  { %v118_v7 = vsel %vm116_vm0, %v832_v4, 0  ;;  %v124_v8 = vsel %vm116_vm0, %v833_v5, 0  ;;  %v834_v10 = vld [vmem:[#allocation7] ss:$8 sps:$4 sm:$0xff]   ;;  %v836_v11 = vld [vmem:[#allocation7 + $0x4] ss:$8 sps:$4 sm:$0xff]  }
  0x3d   :  { %130 = vmatpush1.bf16.msra.mxu0 %v118_v7  ;;  %171 = vmatpush1.bf16.msra.mxu1 %v124_v8  ;;  %v837_v12 = vld [vmem:[#allocation7 + $0x100] ss:$8 sps:$4 sm:$0xff]   ;;  %v839_v13 = vld [vmem:[#allocation7 + $0x104] ss:$8 sps:$4 sm:$0xff]   ;;  %v842_v14 = vld [vmem:[#allocation7 + $0x14] ss:$8 sps:$4 sm:$0xff]  }
  0x3e   :  { %619 = vmatprep.subr.bf16.mxu1 %v836_v11  ;;  %v840_v15 = vld [vmem:[#allocation7 + $0x10] ss:$8 sps:$4 sm:$0xff]   ;;  %v845_v16 = vld [vmem:[#allocation7 + $0x114] ss:$8 sps:$4 sm:$0xff]   ;;  %660 = vmatprep.subr.bf16.mxu0 %v839_v13  ;;  %v848_v18 = vld [vmem:[#allocation7 + $0x24] ss:$8 sps:$4 sm:$0xff]  }
  0x3f   :  { %v843_v17 = vld [vmem:[#allocation7 + $0x110] ss:$8 sps:$4 sm:$0xff]   ;;  %v851_v19 = vld [vmem:[#allocation7 + $0x124] ss:$8 sps:$4 sm:$0xff]   ;;  %v846_v20 = vld [vmem:[#allocation7 + $0x20] ss:$8 sps:$4 sm:$0xff]  }
  0x40   :  { %748 = vmatmul.mubr.msk.bf16.vlgmr.msra.gmra.mrb[0].mxu0 %vm112_vm1, %v69_v9  ;;  %750 = vmatmul.mubr.msk.bf16.vlgmr.msra.gmra.mrb[0].mxu1 %vm112_vm1, %v69_v9  ;;  %v849_v21 = vld [vmem:[#allocation7 + $0x120] ss:$8 sps:$4 sm:$0xff]   ;;  %v854_v22 = vld [vmem:[#allocation7 + $0x34] ss:$8 sps:$4 sm:$0xff]   ;;  %v852_v24 = vld [vmem:[#allocation7 + $0x30] ss:$8 sps:$4 sm:$0xff]  }
  0x41   :  { %620 = vmatpush1.bf16.msra.mxu1 %v834_v10  ;;  %661 = vmatpush1.bf16.msra.mxu0 %v837_v12  ;;  %v857_v23 = vld [vmem:[#allocation7 + $0x134] ss:$8 sps:$4 sm:$0xff]   ;;  %v855_v25 = vld [vmem:[#allocation7 + $0x130] ss:$8 sps:$4 sm:$0xff]   ;;  %v860_v26 = vld [vmem:[#allocation7 + $0x44] ss:$8 sps:$4 sm:$0xff]   ;;  %v76_v10 = vlaneseq }
  0x42   :  { %621 = vmatprep.subr.bf16.mxu1 %v842_v14  ;;  %662 = vmatprep.subr.bf16.mxu0 %v845_v16  ;;  %v863_v27 = vld [vmem:[#allocation7 + $0x144] ss:$8 sps:$4 sm:$0xff]   ;;  %v858_v28 = vld [vmem:[#allocation7 + $0x40] ss:$8 sps:$4 sm:$0xff]   ;;  %v866_v30 = vld [vmem:[#allocation7 + $0x54] ss:$8 sps:$4 sm:$0xff]  }
  0x43   :  { %v861_v29 = vld [vmem:[#allocation7 + $0x140] ss:$8 sps:$4 sm:$0xff]   ;;  %v869_v31 = vld [vmem:[#allocation7 + $0x154] ss:$8 sps:$4 sm:$0xff]   ;;  %v864_v32 = vld [vmem:[#allocation7 + $0x50] ss:$8 sps:$4 sm:$0xff]  }
  0x44   :  { %v867_v33 = vld [vmem:[#allocation7 + $0x150] ss:$8 sps:$4 sm:$0xff]   ;;  %v872_v34 = vld [vmem:[#allocation7 + $0x64] ss:$8 sps:$4 sm:$0xff]   ;;  %v870_v36 = vld [vmem:[#allocation7 + $0x60] ss:$8 sps:$4 sm:$0xff]  }
  0x45   :  { %622 = vmatpush1.bf16.msra.mxu1 %v840_v15  ;;  %663 = vmatpush1.bf16.msra.mxu0 %v843_v17  ;;  %v875_v35 = vld [vmem:[#allocation7 + $0x164] ss:$8 sps:$4 sm:$0xff]   ;;  %v873_v37 = vld [vmem:[#allocation7 + $0x160] ss:$8 sps:$4 sm:$0xff]   ;;  %v878_v38 = vld [vmem:[#allocation7 + $0x74] ss:$8 sps:$4 sm:$0xff]  }
  0x46   :  { %623 = vmatprep.subr.bf16.mxu1 %v848_v18  ;;  %664 = vmatprep.subr.bf16.mxu0 %v851_v19  ;;  %v881_v39 = vld [vmem:[#allocation7 + $0x174] ss:$8 sps:$4 sm:$0xff]   ;;  %v876_v40 = vld [vmem:[#allocation7 + $0x70] ss:$8 sps:$4 sm:$0xff]   ;;  %v884_v42 = vld [vmem:[#allocation7 + $0x84] ss:$8 sps:$4 sm:$0xff]  }
  0x47   :  { %v879_v41 = vld [vmem:[#allocation7 + $0x170] ss:$8 sps:$4 sm:$0xff]   ;;  %v887_v43 = vld [vmem:[#allocation7 + $0x184] ss:$8 sps:$4 sm:$0xff]   ;;  %v882_v44 = vld [vmem:[#allocation7 + $0x80] ss:$8 sps:$4 sm:$0xff]  }
  0x48   :  { %v885_v45 = vld [vmem:[#allocation7 + $0x180] ss:$8 sps:$4 sm:$0xff]   ;;  %v890_v46 = vld [vmem:[#allocation7 + $0x94] ss:$8 sps:$4 sm:$0xff]   ;;  %v888_v47 = vld [vmem:[#allocation7 + $0x90] ss:$8 sps:$4 sm:$0xff]  }
  0x49   :  { %624 = vmatpush1.bf16.msra.mxu1 %v846_v20  ;;  %665 = vmatpush1.bf16.msra.mxu0 %v849_v21  ;;  %v893_v48 = vld [vmem:[#allocation7 + $0x194] ss:$8 sps:$4 sm:$0xff]   ;;  %v891_v49 = vld [vmem:[#allocation7 + $0x190] ss:$8 sps:$4 sm:$0xff]   ;;  %v896_v50 = vld [vmem:[#allocation7 + $0xa4] ss:$8 sps:$4 sm:$0xff]  }
  0x4a   :  { %625 = vmatprep.subr.bf16.mxu1 %v854_v22  ;;  %666 = vmatprep.subr.bf16.mxu0 %v857_v23  ;;  %v899_v51 = vld [vmem:[#allocation7 + $0x1a4] ss:$8 sps:$4 sm:$0xff]   ;;  %v894_v52 = vld [vmem:[#allocation7 + $0xa0] ss:$8 sps:$4 sm:$0xff]   ;;  %v902_v54 = vld [vmem:[#allocation7 + $0xb4] ss:$8 sps:$4 sm:$0xff]  }
  0x4b   :  { %v897_v53 = vld [vmem:[#allocation7 + $0x1a0] ss:$8 sps:$4 sm:$0xff]   ;;  %v905_v55 = vld [vmem:[#allocation7 + $0x1b4] ss:$8 sps:$4 sm:$0xff]   ;;  %v900_v56 = vld [vmem:[#allocation7 + $0xb0] ss:$8 sps:$4 sm:$0xff]  }
  0x4c   :  { %v903_v57 = vld [vmem:[#allocation7 + $0x1b0] ss:$8 sps:$4 sm:$0xff]   ;;  %v908_v58 = vld [vmem:[#allocation7 + $0xc4] ss:$8 sps:$4 sm:$0xff]   ;;  %v906_v60 = vld [vmem:[#allocation7 + $0xc0] ss:$8 sps:$4 sm:$0xff]  }
  0x4d   :  { %626 = vmatpush1.bf16.msra.mxu1 %v852_v24  ;;  %667 = vmatpush1.bf16.msra.mxu0 %v855_v25  ;;  %v911_v59 = vld [vmem:[#allocation7 + $0x1c4] ss:$8 sps:$4 sm:$0xff]   ;;  %v909_v61 = vld [vmem:[#allocation7 + $0x1c0] ss:$8 sps:$4 sm:$0xff]   ;;  %v914_v62 = vld [vmem:[#allocation7 + $0xd4] ss:$8 sps:$4 sm:$0xff]  }
  0x4e   :  { %627 = vmatprep.subr.bf16.mxu1 %v860_v26  ;;  %668 = vmatprep.subr.bf16.mxu0 %v863_v27  ;;  %v917_v63 = vld [vmem:[#allocation7 + $0x1d4] ss:$8 sps:$4 sm:$0xff]   ;;  %v912_v0 = vld [vmem:[#allocation7 + $0xd0] ss:$8 sps:$4 sm:$0xff]   ;;  %v920_v2 = vld [vmem:[#allocation7 + $0xe4] ss:$8 sps:$4 sm:$0xff]  }
  0x4f   :  { %v915_v1 = vld [vmem:[#allocation7 + $0x1d0] ss:$8 sps:$4 sm:$0xff]   ;;  %v923_v3 = vld [vmem:[#allocation7 + $0x1e4] ss:$8 sps:$4 sm:$0xff]   ;;  %v918_v4 = vld [vmem:[#allocation7 + $0xe0] ss:$8 sps:$4 sm:$0xff]  }
  0x50   :  { %v921_v5 = vld [vmem:[#allocation7 + $0x1e0] ss:$8 sps:$4 sm:$0xff]   ;;  %v926_v6 = vld [vmem:[#allocation7 + $0xf4] ss:$8 sps:$4 sm:$0xff]   ;;  %v924_v8 = vld [vmem:[#allocation7 + $0xf0] ss:$8 sps:$4 sm:$0xff]  }
  0x51   :  { %628 = vmatpush1.bf16.msra.mxu1 %v858_v28  ;;  %669 = vmatpush1.bf16.msra.mxu0 %v861_v29  ;;  %v929_v7 = vld [vmem:[#allocation7 + $0x1f4] ss:$8 sps:$4 sm:$0xff]   ;;  %v927_v9 = vld [vmem:[#allocation7 + $0x1f0] ss:$8 sps:$4 sm:$0xff]   ;;  %v77_v11 = vshrl.u32 %v76_v10, 7  ;;  %vm735_vm2 = vcmask 7168  }
  0x52   :  { %629 = vmatprep.subr.bf16.mxu1 %v866_v30  ;;  %670 = vmatprep.subr.bf16.mxu0 %v869_v31  ;;  %v74_v14 = vld [vmem:[%s1105_s2] sm:$0xf] }
  0x53   :  { %v78_v12 = vsub.s32 0, %v77_v11  ;;  %v86_v13 = vsub.s32 2, %v77_v11  ;;  %v82_v15 = vsub.s32 1, %v77_v11  ;;  %v90_v16 = vsub.s32 3, %v77_v11 }
  0x55   :  { %630 = vmatpush1.bf16.msra.mxu1 %v864_v32  ;;  %671 = vmatpush1.bf16.msra.mxu0 %v867_v33  ;;  %v79_v17 = vrot.slane %v74_v14, %v78_v12  ;;  %v87_v18 = vrot.slane %v74_v14, %v86_v13  ;;  %v83_v19 = vrot.slane %v74_v14, %v82_v15 }
  0x56   :  { %631 = vmatprep.subr.bf16.mxu1 %v872_v34  ;;  %672 = vmatprep.subr.bf16.mxu0 %v875_v35  ;;  %v91_v20 = vrot.slane %v74_v14, %v90_v16 }
  0x59   :  { %632 = vmatpush1.bf16.msra.mxu1 %v870_v36  ;;  %673 = vmatpush1.bf16.msra.mxu0 %v873_v37 }
  0x5a   :  { %633 = vmatprep.subr.bf16.mxu1 %v878_v38  ;;  %674 = vmatprep.subr.bf16.mxu0 %v881_v39 }
  0x5d   :  { %634 = vmatpush1.bf16.msra.mxu1 %v876_v40  ;;  %675 = vmatpush1.bf16.msra.mxu0 %v879_v41 }
  0x5e   :  { %635 = vmatprep.subr.bf16.mxu1 %v884_v42  ;;  %676 = vmatprep.subr.bf16.mxu0 %v887_v43 }
  0x61   :  { %636 = vmatpush1.bf16.msra.mxu1 %v882_v44  ;;  %677 = vmatpush1.bf16.msra.mxu0 %v885_v45  ;;  %v287_v45 = vld [vmem:[%s1107_s4] sm:$0x3] }
  0x62   :  { %637 = vmatprep.subr.bf16.mxu1 %v890_v46  ;;  %678 = vmatprep.subr.bf16.mxu0 %v893_v48  ;;  %v292_v46 = vrot.slane %v287_v45, %v78_v12 }
  0x65   :  { %638 = vmatpush1.bf16.msra.mxu1 %v888_v47  ;;  %679 = vmatpush1.bf16.msra.mxu0 %v891_v49  ;;  %v296_v47 = vrot.slane %v287_v45, %v82_v15 }
  0x66   :  { %639 = vmatprep.subr.bf16.mxu1 %v896_v50  ;;  %680 = vmatprep.subr.bf16.mxu0 %v899_v51 }
  0x69   :  { %640 = vmatpush1.bf16.msra.mxu1 %v894_v52  ;;  %681 = vmatpush1.bf16.msra.mxu0 %v897_v53 }
  0x6a   :  { %641 = vmatprep.subr.bf16.mxu1 %v902_v54  ;;  %682 = vmatprep.subr.bf16.mxu0 %v905_v55 }
  0x6d   :  { %642 = vmatpush1.bf16.msra.mxu1 %v900_v56  ;;  %683 = vmatpush1.bf16.msra.mxu0 %v903_v57  ;;  %v705_v56 = vld [vmem:[%s1108_s5] sm:$0x3] }
  0x6e   :  { %643 = vmatprep.subr.bf16.mxu1 %v908_v58  ;;  %684 = vmatprep.subr.bf16.mxu0 %v911_v59 }
  0x71   :  { %644 = vmatpush1.bf16.msra.mxu1 %v906_v60  ;;  %685 = vmatpush1.bf16.msra.mxu0 %v909_v61 }
  0x72   :  { %645 = vmatprep.subr.bf16.mxu1 %v914_v62  ;;  %686 = vmatprep.subr.bf16.mxu0 %v917_v63  ;;  %v710_v62 = vrot.slane %v705_v56, %v78_v12 }
  0x75   :  { %646 = vmatpush1.bf16.msra.mxu1 %v912_v0  ;;  %687 = vmatpush1.bf16.msra.mxu0 %v915_v1  ;;  %v714_v0 = vrot.slane %v705_v56, %v82_v15 }
  0x76   :  { %647 = vmatprep.subr.bf16.mxu1 %v920_v2  ;;  %688 = vmatprep.subr.bf16.mxu0 %v923_v3 }
  0x79   :  { %648 = vmatpush1.bf16.msra.mxu1 %v918_v4  ;;  %689 = vmatpush1.bf16.msra.mxu0 %v921_v5 }
  0x7a   :  { %649 = vmatprep.subr.bf16.mxu1 %v926_v6  ;;  %690 = vmatprep.subr.bf16.mxu0 %v929_v7  ;;  %v815_v6 = vld [vmem:[#allocation2] ss:$0 sm:$0xff] }
  0x7d   :  { %650 = vmatpush1.bf16.msra.mxu1 %v924_v8  ;;  %691 = vmatpush1.bf16.msra.mxu0 %v927_v9 }
 0x113   :  { %v163_v21 = vpop.f32.mrb[0].mxu0  ;;  %v204_v22 = vpop.f32.mrb[0].mxu1 }
 0x114   :  { %v164_v23 = vadd.f32 %v163_v21, %v79_v17  ;;  %v205_v24 = vadd.f32 %v204_v22, %v87_v18  ;;  %v165_v25 = vpop.f32.mrb[1].mxu0  ;;  %v206_v26 = vpop.f32.mrb[1].mxu1 }
 0x115   :  { %v166_v27 = vadd.f32 %v165_v25, %v83_v19  ;;  %v207_v28 = vadd.f32 %v206_v26, %v91_v20  ;;  %v167_v29 = vpop.f32.mrb[2].mxu0  ;;  %v208_v30 = vpop.f32.mrb[2].mxu1 }
 0x116   :  { %v211_v31 = vmul.f32 0.2, %v164_v23  ;;  %v213_v32 = vmul.f32 0.2, %v205_v24  ;;  %v168_v33 = vpop.f32.mrb[3].mxu0  ;;  %v209_v34 = vpop.f32.mrb[3].mxu1 }
 0x117   :  { %v212_v35 = vmul.f32 0.2, %v166_v27  ;;  %v214_v36 = vmul.f32 0.2, %v207_v28 }
 0x118   :  { %v215_v37 = vmax.f32 %v164_v23, %v211_v31  ;;  %v217_v38 = vmax.f32 %v205_v24, %v213_v32 }
 0x119   :  { %v216_v39 = vmax.f32 %v166_v27, %v212_v35  ;;  %v218_v40 = vmax.f32 %v207_v28, %v214_v36 }
 0x11a   :  { %v219_v43 = vpack.c.bf16 %v215_v37, %v215_v37  ;;  %v221_v44 = vpack.c.bf16 %v217_v38, %v217_v38 }
 0x11b   :  { %v220_v41 = vpack.c.bf16 %v216_v39, %v216_v39  ;;  %v222_v42 = vpack.c.bf16 %v218_v40, %v218_v40 }
 0x11d   :  { %651 = vmatprep.mubr.bf16.mxu1 %v220_v41  ;;  %692 = vmatprep.mubr.bf16.mxu0 %v222_v42 }
 0x11e   :  { %652 = vmatmul.mubr.bf16.vlgmr.msra.gmra.mrb[4].mxu1 %v219_v43  ;;  %693 = vmatmul.mubr.bf16.vlgmr.msra.gmra.mrb[4].mxu0 %v221_v44 }
 0x1f1   :  { %v653_v48 = vpop.f32.mrb[4].mxu1  ;;  %v694_v49 = vpop.f32.mrb[4].mxu0 }
 0x1f2   :  { %v654_v50 = vadd.f32 %v653_v48, %v292_v46  ;;  %v655_v51 = vpop.f32.mrb[5].mxu1  ;;  %v696_v52 = vpop.f32.mrb[5].mxu0 }
 0x1f3   :  { %v656_v53 = vadd.f32 %v655_v51, %v296_v47  ;;  %v657_v54 = vpop.f32.mrb[6].mxu1  ;;  %v698_v55 = vpop.f32.mrb[6].mxu0 }
 0x1f4   :  { %v695_v57 = vadd.f32 %v694_v49, %v654_v50  ;;  %v658_v58 = vpop.f32.mrb[7].mxu1  ;;  %v699_v59 = vpop.f32.mrb[7].mxu0 }
 0x1f5   :  { %v697_v60 = vadd.f32 %v696_v52, %v656_v53 }
 0x1f6   :  { %v701_v61 = vmul.f32 0.2, %v695_v57 }
 0x1f7   :  { %v702_v63 = vmul.f32 0.2, %v697_v60 }
 0x1f8   :  { %v703_v1 = vmax.f32 %v695_v57, %v701_v61 }
 0x1f9   :  { %v704_v2 = vmax.f32 %v697_v60, %v702_v63 }
 0x1fa   :  { %v717_v3 = vmul.f32 %v710_v62, %v703_v1 }
 0x1fb   :  { %v718_v4 = vmul.f32 %v714_v0, %v704_v2 }
 0x1fd   :  { %v719_v5 = vadd.f32 %v718_v4, %v717_v3 }
 0x1ff   :  { %720 = vadd.xlane.f32.xlu0 %v719_v5 }
 0x28c   :  { %v721_v7 = vpop.xlane.xlu0 %720 }
 0x28d   :  { %v729_v8 = vadd.f32 %v815_v6, %v721_v7 }
 0x28f   :  { %v730_v9 = vsub.f32 0.0, %v729_v8 }
 0x291   :  { %v731_v10 = vmul.f32 1.442695, %v730_v9 }
 0x293   :  { %930 = vpow2.f32 %v731_v10 }
 0x29d   :  { %v931_v11 = vpop.eup %930 }
 0x29e   :  { %v733_v13 = vadd.f32 1.0, %v931_v11 }
 0x2a0   :  { %932 = vrcp.f32 %v733_v13 }
 0x2aa   :  { %v933_v14 = vpop.eup %932 }
 0x2ab   :  { %736 = vst.msk [vmem:[%s1110_s7] sm:$0xff] %vm735_vm2, %v933_v14 }
 0x2ac   :  { %741 = vsyncpa [#allocation4], 1 }
 0x2ad   :  { %742 = vsyncpa [#allocation6], 1 }

</bundles_post_ra>
